<compile_context>
chip_gen: v7x
topology: tpu7x:2x2x1
jax: 0.10.0
libtpu: 0.0.40
codegen_flags: <defaults>
</compile_context>

<pallas_src>
import jax
import jax.numpy as jnp
import numpy as np
from jax.experimental import pallas as pl
from jax.experimental.pallas import tpu as pltpu

_HALF_LOG_2PI = 0.5 * float(np.log(2.0 * np.pi))


# ---------------------------------------------------------------------------
# Generation-gated sizing
# ---------------------------------------------------------------------------
def _chip_params():
    kind = ""
    try:
        kind = jax.devices()[0].device_kind.lower()
    except Exception:
        pass
    if "v7" in kind:
        # 64 MiB VMEM, 2 TensorCores: smaller blocks, even grid-step count.
        return dict(target_block_bytes=6 << 20, base_vmem_limit=40 << 20,
                    vmem_cap=56 << 20, prefer_even_steps=True)
    if "v5" in kind or "v6" in kind:
        # 128 MiB VMEM, single TC: big blocks to sit near the HBM roofline and
        # amortize the ~0.35 us per-grid-step overhead.
        return dict(target_block_bytes=12 << 20, base_vmem_limit=64 << 20,
                    vmem_cap=100 << 20, prefer_even_steps=False)
    # Unknown backend (incl. CPU interpret): conservative, v7x-safe settings.
    return dict(target_block_bytes=4 << 20, base_vmem_limit=32 << 20,
                vmem_cap=56 << 20, prefer_even_steps=False)


def _choose_batch_tile(n, per_sample_bytes, target_bytes, prefer_even_steps):
    """Pick samples-per-step. Legal bt: divisor of n that is a multiple of 8
    (dense sublanes, (8,128)-conforming blocks) or n itself (full-dim block)."""
    legal = [d for d in range(1, n + 1) if n % d == 0 and (d % 8 == 0 or d == n)]
    fitting = [d for d in legal if d * per_sample_bytes <= target_bytes]
    pool = fitting if fitting else [min(legal)]   # nothing fits -> smallest legal
    def score(bt):
        steps = n // bt
        return (steps >= 2,                                        # pipelining + both TCs
                (steps % 2 == 0) if prefer_even_steps else True,   # v7x balance
                bt % 8 == 0,                                       # dense sublanes
                bt)                                                # amortize per-step cost
    return max(pool, key=score)


def _vmem_limit(block_bytes, params):
    # Double-buffered blocks + headroom; never below the per-gen base, never
    # above the per-gen cap.
    needed = 2 * block_bytes + (2 << 20)
    return int(min(max(params["base_vmem_limit"], needed), params["vmem_cap"]))


# ---------------------------------------------------------------------------
# Forward (reverse=False):  z, z_split = chunk(x, 2, dim=1)
#                           ldj += sum logN(z_split)
# ---------------------------------------------------------------------------
def _split_fwd_kernel(x_ref, z_ref, ss_ref):
    # x_ref: (bt, C*HW)   z_ref: (bt, (C/2)*HW)   ss_ref: (bt, 1) f32
    s = z_ref.shape[-1]
    z_ref[...] = x_ref[:, :s]                     # pass-through half (lane-aligned slice)
    zs = x_ref[:, s:].astype(jnp.float32)         # half evaluated against the prior
    ss_ref[...] = jnp.sum(zs * zs, axis=-1, keepdims=True)


def split_flow_forward(x, log_det_jacobian):
    n, c, h, w = x.shape
    if c % 2 != 0:
        raise ValueError("channel dim must be divisible by split_factor=2")
    half = c // 2
    d = c * h * w            # full per-sample row
    s = half * h * w         # one half (multiple of 128 for typical shapes)

    x2 = x.reshape(n, d)     # lane-dense view, free (row-major)

    params = _chip_params()
    itemsize = jnp.dtype(x.dtype).itemsize
    per_sample = (d + s) * itemsize                     # read full row + write half
    bt = _choose_batch_tile(n, per_sample, params["target_block_bytes"],
                            params["prefer_even_steps"])
    block_bytes = bt * per_sample + 8 * 128 * 4         # + padded ss tile
    grid = (n // bt,)

    z2, ss = pl.pallas_call(
        _split_fwd_kernel,
        out_shape=(
            jax.ShapeDtypeStruct((n, s), x.dtype),
            jax.ShapeDtypeStruct((n, 1), jnp.float32),
        ),
        grid_spec=pltpu.PrefetchScalarGridSpec(
            num_scalar_prefetch=0,
            grid=grid,
            in_specs=[pl.BlockSpec((bt, d), lambda b: (b, 0))],
            out_specs=(
                pl.BlockSpec((bt, s), lambda b: (b, 0)),
                pl.BlockSpec((bt, 1), lambda b: (b, 0)),
            ),
        ),
        compiler_params=pltpu.CompilerParams(
            dimension_semantics=("parallel",),
            vmem_limit_bytes=_vmem_limit(block_bytes, params)),
    )(x2)

    # Fold in ldj and the hoisted constant in the wrapper (tiny XLA op): the
    # kernel carries no (bt,1,1) ldj streams.
    ldj = (log_det_jacobian.astype(jnp.float32)
           + (-0.5 * ss[:, 0] - s * _HALF_LOG_2PI)).astype(log_det_jacobian.dtype)
    return z2.reshape(n, half, h, w), ldj


# ---------------------------------------------------------------------------
# Reverse (reverse=True):  z_split ~ N(0,1)  (sampled in the wrapper)
#                          z = cat((x, z_split), dim=1)
#                          ldj -= sum logN(z_split)
# ---------------------------------------------------------------------------
def _split_rev_kernel(x_ref, noise_ref, z_ref, ss_ref):
    # x_ref, noise_ref: (bt, C*HW)   z_ref: (bt, 2*C*HW)   ss_ref: (bt, 1) f32
    s = x_ref.shape[-1]
    z_ref[:, :s] = x_ref[...]                     # original half
    nz = noise_ref[...]
    z_ref[:, s:] = nz                             # sampled half (stored dtype)
    nzf = nz.astype(jnp.float32)                  # log-prob of exactly what was stored
    ss_ref[...] = jnp.sum(nzf * nzf, axis=-1, keepdims=True)


def split_flow_reverse(x, log_det_jacobian, seed):
    n, c, h, w = x.shape
    s2 = c * h * w

    x2 = x.reshape(n, s2)                               # lane-dense view, free
    # Prior Normal(0,1) sample, drawn outside the kernel (works on TPU and in
    # interpret mode; reproducible regardless of tiling / chip generation).
    noise = jax.random.normal(jax.random.PRNGKey(seed), (n, s2), dtype=x.dtype)

    params = _chip_params()
    itemsize = jnp.dtype(x.dtype).itemsize
    per_sample = 4 * s2 * itemsize                      # read x + noise, write 2*s2
    bt = _choose_batch_tile(n, per_sample, params["target_block_bytes"],
                            params["prefer_even_steps"])
    block_bytes = bt * per_sample + 8 * 128 * 4
    grid = (n // bt,)

    z2, ss = pl.pallas_call(
        _split_rev_kernel,
        out_shape=(
            jax.ShapeDtypeStruct((n, 2 * s2), x.dtype),
            jax.ShapeDtypeStruct((n, 1), jnp.float32),
        ),
        grid_spec=pltpu.PrefetchScalarGridSpec(
            num_scalar_prefetch=0,
            grid=grid,
            in_specs=[
                pl.BlockSpec((bt, s2), lambda b: (b, 0)),
                pl.BlockSpec((bt, s2), lambda b: (b, 0)),
            ],
            out_specs=(
                pl.BlockSpec((bt, 2 * s2), lambda b: (b, 0)),
                pl.BlockSpec((bt, 1), lambda b: (b, 0)),
            ),
        ),
        compiler_params=pltpu.CompilerParams(
            dimension_semantics=("parallel",),
            vmem_limit_bytes=_vmem_limit(block_bytes, params)),
    )(x2, noise)

    # row layout of (n, 2*s2) == cat((x, z_split), dim=1) in NCHW -> reshape is free
    z = z2.reshape(n, 2 * c, h, w)
    # ldj -= sum(-0.5*z^2 - 0.5*log(2*pi))  ==  ldj + 0.5*sum(z^2) + n_elem*0.5*log(2*pi)
    ldj = (log_det_jacobian.astype(jnp.float32)
           + (0.5 * ss[:, 0] + s2 * _HALF_LOG_2PI)).astype(log_det_jacobian.dtype)
    return z, ldj


# ---------------------------------------------------------------------------
# Demo / self-check
# ---------------------------------------------------------------------------
if __name__ == "__main__":
    key = jax.random.PRNGKey(0)
    kx, kl = jax.random.split(key, 2)

    # SplitFlow(split_factor=2), prior = Normal(0, 1)
    N, C, H, W = 2, 4, 16, 16
    x = jax.random.normal(kx, (N, C, H, W), dtype=jnp.float32)
    ldj = jax.random.normal(kl, (N,), dtype=jnp.float32)

    # forward (reverse=False)
    z, ldj_out = split_flow_forward(x, ldj)
    jax.block_until_ready((z, ldj_out))

    half = C // 2
    x_np = np.asarray(x, np.float64)
    lp = -0.5 * x_np[:, half:] ** 2 - _HALF_LOG_2PI
    np.testing.assert_array_equal(np.asarray(z), np.asarray(x)[:, :half])
    np.testing.assert_allclose(np.asarray(ldj_out),
                               np.asarray(ldj, np.float64) + lp.sum(axis=(1, 2, 3)),
                               rtol=1e-5, atol=1e-3)

    # reverse (reverse=True)
    z_rev, ldj_rev = split_flow_reverse(z, ldj_out, seed=1234)
    jax.block_until_ready((z_rev, ldj_rev))
    assert z_rev.shape == (N, C, H, W) and ldj_rev.shape == (N,)
    np.testing.assert_array_equal(np.asarray(z_rev[:, :half]), np.asarray(z))

    # ldj consistency against the z_split actually written to the output
    z_split = np.asarray(z_rev[:, half:], np.float64)
    lp2 = -0.5 * z_split ** 2 - _HALF_LOG_2PI
    np.testing.assert_allclose(np.asarray(ldj_rev),
                               np.asarray(ldj_out, np.float64) - lp2.sum(axis=(1, 2, 3)),
                               rtol=1e-4, atol=1e-2)

    print("KERNEL_OK")
</pallas_src>

<mosaic_0001>
module attributes {stable_mosaic.version = 11 : i64} {
  func.func @_split_fwd_kernel(%arg0: i32, %arg1: memref<2x1024xf32, #tpu.memory_space<vmem>>, %arg2: memref<2x512xf32, #tpu.memory_space<vmem>>, %arg3: memref<2x1xf32, #tpu.memory_space<vmem>>) attributes {dimension_semantics = [#tpu.dimension_semantics<parallel>], iteration_bounds = array<i64: 1>, scalar_prefetch = 0 : i64, scratch_operands = 0 : i64, tpu.core_type = #tpu.core_type<tc>, window_params = [{transform_indices = @transform_0, window_bounds = array<i64: 2, 1024>}, {transform_indices = @transform_1, window_bounds = array<i64: 2, 512>}, {transform_indices = @transform_2, window_bounds = array<i64: 2, 1>}]} {
    %c0 = arith.constant 0 : index
    %c0_0 = arith.constant 0 : index
    %0 = vector.load %arg1[%c0, %c0_0] : memref<2x1024xf32, #tpu.memory_space<vmem>>, vector<2x512xf32>
    %c0_1 = arith.constant 0 : index
    %c0_2 = arith.constant 0 : index
    %1 = vector.load %arg2[%c0_1, %c0_2] : memref<2x512xf32, #tpu.memory_space<vmem>>, vector<2x512xf32>
    tpu.vector_store %arg2[%c0_1, %c0_2], %0 {strides = array<i32>} : memref<2x512xf32, #tpu.memory_space<vmem>>, vector<2x512xf32>,
    %c0_3 = arith.constant 0 : index
    %c512 = arith.constant 512 : index
    %2 = vector.load %arg1[%c0_3, %c512] : memref<2x1024xf32, #tpu.memory_space<vmem>>, vector<2x512xf32>
    %3 = arith.mulf %2, %2 : vector<2x512xf32>
    %cst = arith.constant dense<0.000000e+00> : vector<2xf32>
    %4 = vector.multi_reduction <add>, %3, %cst [1] : vector<2x512xf32> to vector<2xf32>
    %5 = vector.shape_cast %4 : vector<2xf32> to vector<2x1xf32>
    %c0_4 = arith.constant 0 : index
    %c0_5 = arith.constant 0 : index
    %6 = vector.load %arg3[%c0_4, %c0_5] : memref<2x1xf32, #tpu.memory_space<vmem>>, vector<2x1xf32>
    tpu.vector_store %arg3[%c0_4, %c0_5], %5 {strides = array<i32>} : memref<2x1xf32, #tpu.memory_space<vmem>>, vector<2x1xf32>,
    return
  }
  func.func @transform_0(%arg0: i32) -> (i32, i32) {
    %c0_i32 = arith.constant 0 : i32
    %c0_i32_0 = arith.constant 0 : i32
    return %arg0, %c0_i32 : i32, i32
  }
  func.func @transform_1(%arg0: i32) -> (i32, i32) {
    %c0_i32 = arith.constant 0 : i32
    %c0_i32_0 = arith.constant 0 : i32
    return %arg0, %c0_i32 : i32, i32
  }
  func.func @transform_2(%arg0: i32) -> (i32, i32) {
    %c0_i32 = arith.constant 0 : i32
    %c0_i32_0 = arith.constant 0 : i32
    return %arg0, %c0_i32 : i32, i32
  }
}

</mosaic_0001>

<bundles_post_ra>
// kernel: tpu_custom_call.1
= control target key start
LH: loop header
LB: loop body
LE: loop exit
PB: predicated region body
PF: predicated region fallthrough
CT: control target
= control target key end

     0   :  { %8 = vsyncpa [#allocation3], 0  ;;  %s176_s0 = inlined_call_operand.hbm [shape: f32[2,1024], index: 0, kind: input, shape index: {}]   ;;  %s177_s1 = inlined_call_operand.hbm [shape: f32[2,512], index: 1, kind: output, shape index: {0}]   ;;  %s178_s2 = inlined_call_operand.vmem [shape: f32[2,1], index: 2, kind: output, shape index: {1}]  }
   0x1   :  { %9 = vsyncpa [#allocation4], 0  ;;  %s131_s9 = smov [#allocation2]   ;;  %s83_s13 = scalar_lea.hbm %s176_s0, 256 }
   0x2   :  { %s16_s10 = sshll.u32 %s131_s9, 4  ;;  %p84_p0 = scmp.ne.s32.totalorder %s176_s0, %s83_s13  ;;  %s17_s10 = int_to_ptr.vmem [resolvable:$true] %s16_s10 }
   0x3   :  { %p87_p1 = scmp.lt.u32.totalorder %s83_s13, %s176_s0 }
   0x5   :  { %p89_p2 = pnand %p87_p1, %p84_p0 }
   0x7   :  { %92 = shalt.err (!%p89_p2)
}
   0x8   :  { %s93_s18 = scalar_lea.vmem %s17_s10, 256  ;;  %p98_p4 = scmp.lt.s32.totalorder %s17_s10, %s17_s10 }
   0x9   :  { %p94_p3 = scmp.ne.s32.totalorder %s17_s10, %s93_s18  ;;  %p99_p5 = scmp.lt.s32.totalorder %s93_s18, %s93_s18 }
   0xb   :  { %p100_p6 = por %p99_p5, %p98_p4 }
   0xd   :  { %p101_p7 = pnand %p100_p6, %p94_p3 }
   0xf   :  { %104 = shalt.err (!%p101_p7)
}
  0x10   :  { %19 = dma.hbm_to_vmem [thread:$0]  %s176_s0, 256, %s17_s10, [#allocation3]  }
  0x11   :  { %127 = dma.done.wait [#allocation3], 256  }
  0x12   :  { %128 = vsyncadd [#allocation3], 4294967040  ;;  %v32_v0 = vlaneseq  ;;  %v132_v1 = vmov 1983009808   ;;  %v25_v6 = vld [vmem:[#allocation2 + $0x8] sm:$0xff]  ;;  %vm49_vm0 = vcmask 1041408  }
  0x13   :  { %v30_v2 = vunpack.c.l.s4 %v132_v1  ;;  %v26_v7 = vmul.f32 %v25_v6, %v25_v6  ;;  %v23_v20 = vld [vmem:[#allocation2] sm:$0xff]  ;;  %s133_s0 = smov [#allocation5]  }
  0x14   :  { %v33_v3 = vshrl.u32 %v32_v0, 7  ;;  %s67_s21 = sshll.u32 %s133_s0, 4  ;;  %24 = vst [vmem:[#allocation5] sm:$0xff] %v23_v20  ;;  %s68_s21 = int_to_ptr.vmem [resolvable:$true] %s67_s21 }
  0x15   :  { %v31_v4 = vunpack.c.0.s8 %v30_v2  ;;  %v28_v8 = vcombine.high %v26_v7, %v26_v7  ;;  %s105_s22 = scalar_lea.vmem %s68_s21, 128  ;;  %p110_p9 = scmp.lt.s32.totalorder %s68_s21, %s68_s21 }
  0x16   :  { %p106_p8 = scmp.ne.s32.totalorder %s68_s21, %s105_s22  ;;  %p111_p10 = scmp.lt.s32.totalorder %s105_s22, %s105_s22 }
  0x17   :  { %v34_v5 = vsub.s32 %v31_v4, %v33_v3 }
  0x18   :  { %p112_p11 = por %p111_p10, %p110_p9 }
  0x19   :  { %v35_v9 = vrot.slane %v26_v7, %v34_v5  ;;  %v42_v10 = vrot.slane %v28_v8, %v34_v5 }
  0x1a   :  { %p113_p12 = pnand %p112_p11, %p106_p8 }
  0x1b   :  { %v43_v11 = vcombine.high %v35_v9, %v35_v9  ;;  %v50_v12 = vsel %vm49_vm0, %v35_v9, 0.0  ;;  %v44_v13 = vcombine.high %v42_v10, %v42_v10  ;;  %v53_v15 = vsel %vm49_vm0, %v42_v10, 0.0 }
  0x1d   :  { %v51_v14 = vsel %vm49_vm0, %v43_v11, 0.0  ;;  %v55_v17 = vsel %vm49_vm0, %v44_v13, 0.0 }
  0x1e   :  { %v52_v16 = vadd.f32 %v51_v14, %v50_v12 }
  0x20   :  { %v54_v18 = vadd.f32 %v53_v15, %v52_v16 }
  0x22   :  { %v56_v19 = vadd.f32 %v55_v17, %v54_v18 }
  0x24   :  { %57 = vadd.xlane.f32.xlu0 %v56_v19 }
  0x25   :  { %116 = shalt.err (!%p113_p12)
}
  0x26   :  { %s117_s25 = scalar_lea.hbm %s177_s1, 128 }
  0x27   :  { %p118_p13 = scmp.ne.s32.totalorder %s177_s1, %s117_s25  ;;  %p121_p0 = scmp.lt.u32.totalorder %s117_s25, %s177_s1 }
  0x29   :  { %p123_p1 = pnand %p121_p0, %p118_p13 }
  0x2b   :  { %126 = shalt.err (!%p123_p1)
}
  0x2c   :  { %70 = dma.vmem_to_hbm [thread:$0]  %s68_s21, 128, %s177_s1, [#allocation4]   ;;  %vm59_vm1 = vcmask 1024  }
  0xb1   :  { %v58_v21 = vpop.xlane.xlu0 %57 }
  0xb2   :  { %60 = vst.msk [vmem:[%s178_s2] sm:$0x3] %vm59_vm1, %v58_v21 }
  0xb3   :  { %129 = dma.done.wait [#allocation4], 128  }
  0xb4   :  { %130 = vsyncadd [#allocation4], 4294967168 }
  0xb5   :  { %78 = vsyncpa [#allocation3], 1 }
  0xb6   :  { %79 = vsyncpa [#allocation4], 1 }

</bundles_post_ra>
